<compile_context>
chip_gen: v7x
topology: tpu7x:2x2x1
jax: 0.10.0
libtpu: 0.0.40
codegen_flags: <defaults>
</compile_context>

<pallas_src>
import jax
import jax.numpy as jnp
from jax import lax
from jax.experimental import pallas as pl
from jax.experimental.pallas import tpu as pltpu


# Default points-per-grid-step.  16K rows -> ~1 MiB output block + ~1 MiB
# (lane-padded) input block per buffer plus a few MiB of temporaries:
# comfortably inside the default scoped VMEM on v5e/v6e/v7x while keeping
# the ~0.35 us per-step overhead well amortized.
_DEFAULT_TILE_N = 16384


def _mbh_kernel(pos_ref, x_ref, out_ref):
    # pos_ref: (K, 3)  f32 in SMEM  (whole array, scalar reads)
    # x_ref:   (S, 32) f32 in VMEM; x_ref[s, 4*m + c] = x[8*s + m, c]
    # out_ref: (S, 128) f32 in VMEM; out_ref[s, 16*m + j] = e[8*s + m, j//4, j%4]
    xb = x_ref[...]                                    # (S, 32)
    S = xb.shape[0]
    K = pos_ref.shape[0]

    def mxu(a, b):
        # Exact-enough f32 matmul on the (otherwise idle) MXU.
        return jnp.dot(a, b, precision=lax.Precision.HIGHEST,
                       preferred_element_type=jnp.float32)

    # ---- gather spatial coords of the 8 packed points into (S, 8) ----------
    # g*[l, m] = 1 iff input lane l holds coordinate c of point m (c = x,y,z).
    src = lax.broadcasted_iota(jnp.int32, (32, 8), 0)   # source lane 0..31
    dst = lax.broadcasted_iota(jnp.int32, (32, 8), 1)   # packed point 0..7
    gx = (src == 4 * dst + 1).astype(jnp.float32)
    gy = (src == 4 * dst + 2).astype(jnp.float32)
    gz = (src == 4 * dst + 3).astype(jnp.float32)
    cx = mxu(xb, gx)                                    # (S, 8) spatial x
    cy = mxu(xb, gy)                                    # (S, 8) spatial y
    cz = mxu(xb, gz)                                    # (S, 8) spatial z

    # ---- psi = 1 + sum_k 0.5 / r_k  (M = 1.0 folded into the 0.5) -----------
    psi = jnp.ones((S, 8), jnp.float32)
    for k in range(K):                                  # K is static -> unrolled
        dx = cx - pos_ref[k, 0]
        dy = cy - pos_ref[k, 1]
        dz = cz - pos_ref[k, 2]
        r2 = dx * dx + dy * dy + dz * dz                # no cross-lane reduce
        psi = psi + 0.5 * lax.rsqrt(r2)                 # EUP rsqrt

    psi2 = psi * psi
    inv_psi2 = 1.0 / psi2                               # exact divide (accuracy)

    # ---- scatter onto the flattened 4x4 diagonals (single fused matmul) ----
    # pq = [inv_psi2 | psi2] : (S, 16).  Selection matrix eM : (16, 128):
    #   row m      (m in 0..7)  -> output lane 16*m            (e[.,0,0])
    #   row m + 8  (m in 0..7)  -> output lanes 16*m + {5,10,15} (spatial diag)
    pq = jnp.concatenate([inv_psi2, psi2], axis=1)      # (S, 16)
    rr = lax.broadcasted_iota(jnp.int32, (16, 128), 0)
    cc = lax.broadcasted_iota(jnp.int32, (16, 128), 1)
    sel_inv = (rr < 8) & (cc == 16 * rr)
    j = cc - 16 * (rr - 8)
    sel_psi = (rr >= 8) & ((j == 5) | (j == 10) | (j == 15))
    eM = (sel_inv | sel_psi).astype(jnp.float32)

    out_ref[...] = mxu(pq, eM)                          # full 128-lane stores


def multi_black_hole_network(x, pos, *, tile_n=_DEFAULT_TILE_N):
    """x: (N, 4) f32, pos: (K, 3) f32 -> (N, 4, 4) f32 metric."""
    N = x.shape[0]
    assert x.shape[1] == 4, "expected rows [t, x, y, z]"
    x = x.astype(jnp.float32)
    pos = pos.astype(jnp.float32)

    # Tile must be a multiple of 64 points so both slab blocks satisfy the
    # (8, 128) BlockSpec divisibility constraint.
    tile_n = max(64, ((min(int(tile_n), max(N, 1)) + 63) // 64) * 64)
    n_blocks = pl.cdiv(N, tile_n)
    n_pad = n_blocks * tile_n
    if n_pad != N:
        # Edge-pad: duplicated real points stay finite; padded rows are
        # sliced away below.
        x = jnp.pad(x, ((0, n_pad - N), (0, 0)), mode="edge")

    # Free, layout-preserving reshapes (row-major contiguity unchanged).
    x_slab = x.reshape(n_pad // 8, 32)
    s_tile = tile_n // 8

    out_slab = pl.pallas_call(
        _mbh_kernel,
        out_shape=jax.ShapeDtypeStruct((n_pad // 8, 128), jnp.float32),
        grid=(n_blocks,),
        in_specs=[
            pl.BlockSpec(memory_space=pltpu.MemorySpace.SMEM),   # pos (whole)
            pl.BlockSpec((s_tile, 32), lambda i: (i, 0)),        # x slab tile
        ],
        out_specs=pl.BlockSpec((s_tile, 128), lambda i: (i, 0)),
        compiler_params=pltpu.CompilerParams(
            dimension_semantics=("parallel",)),
    )(pos, x_slab)

    e = out_slab.reshape(n_pad, 4, 4)          # free reshape back to (N,4,4)
    return e[:N] if n_pad != N else e


def _reference(x, pos):
    # Pure-JAX reference reproducing the PyTorch forward exactly.
    N = x.shape[0]
    M = 1.0
    psi = jnp.ones((N,), jnp.float32)
    for k in range(pos.shape[0]):
        r = jnp.linalg.norm(x[:, 1:] - pos[k], axis=1)
        psi = psi + M / 2.0 / r
    e = jnp.zeros((N, 4, 4), jnp.float32)
    e = e.at[:, 0, 0].set(1.0 / jnp.square(psi))
    e = e.at[:, 1, 1].set(jnp.square(psi))
    e = e.at[:, 2, 2].set(jnp.square(psi))
    e = e.at[:, 3, 3].set(jnp.square(psi))
    return e


if __name__ == "__main__":
    key = jax.random.PRNGKey(0)
    N = 128                                  # small batch of spacetime points
    x = jax.random.normal(key, (N, 4), dtype=jnp.float32)

    # Two black holes at deterministic positions (the module's self.pos).
    pos = jnp.array([[1.0, 0.0, 0.0],
                     [-1.0, 0.0, 0.0]], dtype=jnp.float32)

    # Small tile so the demo exercises a multi-step pipelined grid (2 steps).
    e = multi_black_hole_network(x, pos, tile_n=64)
    e = jax.block_until_ready(e)

    e_ref = _reference(x, pos)
    assert e.shape == (N, 4, 4)
    assert jnp.allclose(e, e_ref, rtol=1e-5, atol=1e-5), "mismatch vs reference"

    print("KERNEL_OK")
</pallas_src>

<mosaic_0001>
module attributes {stable_mosaic.version = 11 : i64} {
  func.func @_mbh_kernel(%arg0: i32, %arg1: memref<2x3xf32, #tpu.memory_space<smem>>, %arg2: memref<8x32xf32, #tpu.memory_space<vmem>>, %arg3: memref<8x128xf32, #tpu.memory_space<vmem>>) attributes {dimension_semantics = [#tpu.dimension_semantics<parallel>], iteration_bounds = array<i64: 2>, scalar_prefetch = 0 : i64, scratch_operands = 0 : i64, tpu.core_type = #tpu.core_type<tc>, window_params = [{transform_indices = @transform_0, window_bounds = array<i64: 2, 3>}, {transform_indices = @transform_1, window_bounds = array<i64: 8, 32>}, {transform_indices = @transform_2, window_bounds = array<i64: 8, 128>}]} {
    %c0 = arith.constant 0 : index
    %c0_0 = arith.constant 0 : index
    %0 = vector.load %arg2[%c0, %c0_0] : memref<8x32xf32, #tpu.memory_space<vmem>>, vector<8x32xf32>
    %1 = tpu.iota {dimensions = array<i32: 0>} : vector<32x8xi32>
    %2 = tpu.iota {dimensions = array<i32: 1>} : vector<32x8xi32>
    %c4_i32 = arith.constant 4 : i32
    %3 = vector.broadcast %c4_i32 : i32 to vector<32x8xi32>
    %4 = arith.muli %3, %2 : vector<32x8xi32>
    %c1_i32 = arith.constant 1 : i32
    %5 = vector.broadcast %c1_i32 : i32 to vector<32x8xi32>
    %6 = arith.addi %4, %5 : vector<32x8xi32>
    %7 = arith.cmpi eq, %1, %6 : vector<32x8xi32>
    %8 = arith.extui %7 : vector<32x8xi1> to vector<32x8xi32>
    %9 = arith.sitofp %8 : vector<32x8xi32> to vector<32x8xf32>
    %c4_i32_1 = arith.constant 4 : i32
    %10 = vector.broadcast %c4_i32_1 : i32 to vector<32x8xi32>
    %11 = arith.muli %10, %2 : vector<32x8xi32>
    %c2_i32 = arith.constant 2 : i32
    %12 = vector.broadcast %c2_i32 : i32 to vector<32x8xi32>
    %13 = arith.addi %11, %12 : vector<32x8xi32>
    %14 = arith.cmpi eq, %1, %13 : vector<32x8xi32>
    %15 = arith.extui %14 : vector<32x8xi1> to vector<32x8xi32>
    %16 = arith.sitofp %15 : vector<32x8xi32> to vector<32x8xf32>
    %c4_i32_2 = arith.constant 4 : i32
    %17 = vector.broadcast %c4_i32_2 : i32 to vector<32x8xi32>
    %18 = arith.muli %17, %2 : vector<32x8xi32>
    %c3_i32 = arith.constant 3 : i32
    %19 = vector.broadcast %c3_i32 : i32 to vector<32x8xi32>
    %20 = arith.addi %18, %19 : vector<32x8xi32>
    %21 = arith.cmpi eq, %1, %20 : vector<32x8xi32>
    %22 = arith.extui %21 : vector<32x8xi1> to vector<32x8xi32>
    %23 = arith.sitofp %22 : vector<32x8xi32> to vector<32x8xf32>
    %cst = arith.constant dense<0.000000e+00> : vector<8x8xf32>
    %24 = tpu.matmul %0, %9, %cst {dimension_numbers = #tpu.dot_dimension_numbers<[1], [0], [0], [1], [0, 0, 1, 1], [], []>, precision = #tpu.contract_precision<fp32>} : vector<8x32xf32>, vector<32x8xf32>, vector<8x8xf32> -> vector<8x8xf32>
    %cst_3 = arith.constant dense<0.000000e+00> : vector<8x8xf32>
    %25 = tpu.matmul %0, %16, %cst_3 {dimension_numbers = #tpu.dot_dimension_numbers<[1], [0], [0], [1], [0, 0, 1, 1], [], []>, precision = #tpu.contract_precision<fp32>} : vector<8x32xf32>, vector<32x8xf32>, vector<8x8xf32> -> vector<8x8xf32>
    %cst_4 = arith.constant dense<0.000000e+00> : vector<8x8xf32>
    %26 = tpu.matmul %0, %23, %cst_4 {dimension_numbers = #tpu.dot_dimension_numbers<[1], [0], [0], [1], [0, 0, 1, 1], [], []>, precision = #tpu.contract_precision<fp32>} : vector<8x32xf32>, vector<32x8xf32>, vector<8x8xf32> -> vector<8x8xf32>
    %cst_5 = arith.constant 1.000000e+00 : f32
    %27 = vector.broadcast %cst_5 : f32 to vector<8x8xf32>
    %c0_6 = arith.constant 0 : index
    %c0_7 = arith.constant 0 : index
    %28 = memref.load %arg1[%c0_6, %c0_7] : memref<2x3xf32, #tpu.memory_space<smem>>
    %29 = vector.broadcast %28 : f32 to vector<8x8xf32>
    %30 = arith.subf %24, %29 : vector<8x8xf32>
    %c0_8 = arith.constant 0 : index
    %c1 = arith.constant 1 : index
    %31 = memref.load %arg1[%c0_8, %c1] : memref<2x3xf32, #tpu.memory_space<smem>>
    %32 = vector.broadcast %31 : f32 to vector<8x8xf32>
    %33 = arith.subf %25, %32 : vector<8x8xf32>
    %c0_9 = arith.constant 0 : index
    %c2 = arith.constant 2 : index
    %34 = memref.load %arg1[%c0_9, %c2] : memref<2x3xf32, #tpu.memory_space<smem>>
    %35 = vector.broadcast %34 : f32 to vector<8x8xf32>
    %36 = arith.subf %26, %35 : vector<8x8xf32>
    %37 = arith.mulf %30, %30 : vector<8x8xf32>
    %38 = arith.mulf %33, %33 : vector<8x8xf32>
    %39 = arith.addf %37, %38 : vector<8x8xf32>
    %40 = arith.mulf %36, %36 : vector<8x8xf32>
    %41 = arith.addf %39, %40 : vector<8x8xf32>
    %42 = math.rsqrt %41 : vector<8x8xf32>
    %cst_10 = arith.constant 5.000000e-01 : f32
    %43 = vector.broadcast %cst_10 : f32 to vector<8x8xf32>
    %44 = arith.mulf %43, %42 : vector<8x8xf32>
    %45 = arith.addf %27, %44 : vector<8x8xf32>
    %c1_11 = arith.constant 1 : index
    %c0_12 = arith.constant 0 : index
    %46 = memref.load %arg1[%c1_11, %c0_12] : memref<2x3xf32, #tpu.memory_space<smem>>
    %47 = vector.broadcast %46 : f32 to vector<8x8xf32>
    %48 = arith.subf %24, %47 : vector<8x8xf32>
    %c1_13 = arith.constant 1 : index
    %c1_14 = arith.constant 1 : index
    %49 = memref.load %arg1[%c1_13, %c1_14] : memref<2x3xf32, #tpu.memory_space<smem>>
    %50 = vector.broadcast %49 : f32 to vector<8x8xf32>
    %51 = arith.subf %25, %50 : vector<8x8xf32>
    %c1_15 = arith.constant 1 : index
    %c2_16 = arith.constant 2 : index
    %52 = memref.load %arg1[%c1_15, %c2_16] : memref<2x3xf32, #tpu.memory_space<smem>>
    %53 = vector.broadcast %52 : f32 to vector<8x8xf32>
    %54 = arith.subf %26, %53 : vector<8x8xf32>
    %55 = arith.mulf %48, %48 : vector<8x8xf32>
    %56 = arith.mulf %51, %51 : vector<8x8xf32>
    %57 = arith.addf %55, %56 : vector<8x8xf32>
    %58 = arith.mulf %54, %54 : vector<8x8xf32>
    %59 = arith.addf %57, %58 : vector<8x8xf32>
    %60 = math.rsqrt %59 : vector<8x8xf32>
    %cst_17 = arith.constant 5.000000e-01 : f32
    %61 = vector.broadcast %cst_17 : f32 to vector<8x8xf32>
    %62 = arith.mulf %61, %60 : vector<8x8xf32>
    %63 = arith.addf %45, %62 : vector<8x8xf32>
    %64 = arith.mulf %63, %63 : vector<8x8xf32>
    %cst_18 = arith.constant 1.000000e+00 : f32
    %65 = vector.broadcast %cst_18 : f32 to vector<8x8xf32>
    %66 = arith.divf %65, %64 : vector<8x8xf32>
    %67 = tpu.concatenate %66, %64 in 1 : vector<8x8xf32>, vector<8x8xf32> -> vector<8x16xf32>
    %68 = tpu.iota {dimensions = array<i32: 0>} : vector<16x128xi32>
    %69 = tpu.iota {dimensions = array<i32: 1>} : vector<16x128xi32>
    %c8_i32 = arith.constant 8 : i32
    %70 = vector.broadcast %c8_i32 : i32 to vector<16x128xi32>
    %71 = arith.cmpi slt, %68, %70 : vector<16x128xi32>
    %c16_i32 = arith.constant 16 : i32
    %72 = vector.broadcast %c16_i32 : i32 to vector<16x128xi32>
    %73 = arith.muli %72, %68 : vector<16x128xi32>
    %74 = arith.cmpi eq, %69, %73 : vector<16x128xi32>
    %75 = arith.andi %71, %74 : vector<16x128xi1>
    %c8_i32_19 = arith.constant 8 : i32
    %76 = vector.broadcast %c8_i32_19 : i32 to vector<16x128xi32>
    %77 = arith.subi %68, %76 : vector<16x128xi32>
    %c16_i32_20 = arith.constant 16 : i32
    %78 = vector.broadcast %c16_i32_20 : i32 to vector<16x128xi32>
    %79 = arith.muli %78, %77 : vector<16x128xi32>
    %80 = arith.subi %69, %79 : vector<16x128xi32>
    %c8_i32_21 = arith.constant 8 : i32
    %81 = vector.broadcast %c8_i32_21 : i32 to vector<16x128xi32>
    %82 = arith.cmpi sge, %68, %81 : vector<16x128xi32>
    %c5_i32 = arith.constant 5 : i32
    %83 = vector.broadcast %c5_i32 : i32 to vector<16x128xi32>
    %84 = arith.cmpi eq, %80, %83 : vector<16x128xi32>
    %c10_i32 = arith.constant 10 : i32
    %85 = vector.broadcast %c10_i32 : i32 to vector<16x128xi32>
    %86 = arith.cmpi eq, %80, %85 : vector<16x128xi32>
    %87 = arith.ori %84, %86 : vector<16x128xi1>
    %c15_i32 = arith.constant 15 : i32
    %88 = vector.broadcast %c15_i32 : i32 to vector<16x128xi32>
    %89 = arith.cmpi eq, %80, %88 : vector<16x128xi32>
    %90 = arith.ori %87, %89 : vector<16x128xi1>
    %91 = arith.andi %82, %90 : vector<16x128xi1>
    %92 = arith.ori %75, %91 : vector<16x128xi1>
    %93 = arith.extui %92 : vector<16x128xi1> to vector<16x128xi32>
    %94 = arith.sitofp %93 : vector<16x128xi32> to vector<16x128xf32>
    %cst_22 = arith.constant dense<0.000000e+00> : vector<8x128xf32>
    %95 = tpu.matmul %67, %94, %cst_22 {dimension_numbers = #tpu.dot_dimension_numbers<[1], [0], [0], [1], [0, 0, 1, 1], [], []>, precision = #tpu.contract_precision<fp32>} : vector<8x16xf32>, vector<16x128xf32>, vector<8x128xf32> -> vector<8x128xf32>
    %c0_23 = arith.constant 0 : index
    %c0_24 = arith.constant 0 : index
    %96 = vector.load %arg3[%c0_23, %c0_24] : memref<8x128xf32, #tpu.memory_space<vmem>>, vector<8x128xf32>
    tpu.vector_store %arg3[%c0_23, %c0_24], %95 {strides = array<i32>} : memref<8x128xf32, #tpu.memory_space<vmem>>, vector<8x128xf32>,
    return
  }
  func.func @transform_0(%arg0: i32) -> (i32, i32) {
    %c0_i32 = arith.constant 0 : i32
    %c0_i32_0 = arith.constant 0 : i32
    %c0_i32_1 = arith.constant 0 : i32
    return %c0_i32, %c0_i32_0 : i32, i32
  }
  func.func @transform_1(%arg0: i32) -> (i32, i32) {
    %c0_i32 = arith.constant 0 : i32
    %c0_i32_0 = arith.constant 0 : i32
    return %arg0, %c0_i32 : i32, i32
  }
  func.func @transform_2(%arg0: i32) -> (i32, i32) {
    %c0_i32 = arith.constant 0 : i32
    %c0_i32_0 = arith.constant 0 : i32
    return %arg0, %c0_i32 : i32, i32
  }
}

</mosaic_0001>

<bundles_post_ra>
// kernel: tpu_custom_call.1
= control target key start
LH: loop header
LB: loop body
LE: loop exit
PB: predicated region body
PF: predicated region fallthrough
CT: control target
= control target key end

     0   :  { %7 = vsyncpa [#allocation5], 0  ;;  %s3704_s0 = inlined_call_operand.hbm [shape: f32[2,3], index: 0, kind: input, shape index: {}]   ;;  %s3705_s1 = inlined_call_operand.hbm [shape: f32[16,32], index: 1, kind: input, shape index: {}]   ;;  %s3706_s2 = inlined_call_operand.hbm [shape: f32[16,128], index: 2, kind: output, shape index: {}]  }
   0x1   :  { %8 = vsyncpa [#allocation3], 0 }
   0x2   :  { %10 = vsyncpa [#allocation3 + $0x1], 0 }
   0x3   :  { %11 = vsyncpa [#allocation4], 0 }
   0x4   :  { %13 = vsyncpa [#allocation4 + $0x1], 0  ;;  %s3108_s9 = smov 0   ;;  %s3110_s10 = smov 0  }
   0x5   :  { %s3112_s11 = smov 0   ;;  %s3114_s12 = smov 0  }
   0x6 LB: > { %s3129_s13 = sadd.s32 4294967295, %s3083_s12   ;;  %s2313_s14 = sadd.s32 4294967294, %s3083_s12   ;;  %s3083_s12 = sphi %s3114_s12, %s3741_s12   ;;  %s3079_s11 = sphi %s3112_s11, %s3740_s11   ;;  %s3075_s10 = sphi %s3110_s10, %s3739_s10   ;;  %s3071_s9 = sphi %s3108_s9, %s3738_s9  }
   0x7   : > { %p60_p0 = scmp.ne.s32.totalorder %s3075_s10, %s3071_s9  ;;  %p3707_p1 = scmp.eq.s32.totalorder %s3129_s13, 0 }
   0x8   : > { %p90_p3 = scmp.eq.s32.totalorder %s2313_s14, 1  ;;  %p2314_p5 = scmp.ge.s32.totalorder %s3083_s12, 1 }
   0x9   : > { %p3138_p4 = por %p3707_p1, %p60_p0  ;;  %p97_p7 = scmp.lt.s32.totalorder %s3083_s12, 3 }
   0xa   : > { %p3143_p6 = por %p90_p3, %p60_p0  ;;  %s3154_s18 = sadd.s32 1, %s3083_s12  }
   0xb   : > { %s3710_s15 = scalar_select %p3138_p4, 1, 0 }
   0xc   : > { %s3711_s16 = scalar_select %p3143_p6, 1, 0 }
   0xd   : > { %p3148_p8 = pnand %p2314_p5, %p97_p7  ;;  %s44_s19 = ssub.s32 %s3083_s12, %s3154_s18 }
   0xe   : > { %s47_s20 = sadd.s32 1, %s3079_s11  ;;  %p3167_p12 = scmp.eq.s32.totalorder %s44_s19, 0 }
   0xf   : > { %p2910_p10 = pneg %p3148_p8  ;;  %p54_p13 = scmp.ne.s32.totalorder %s3079_s11, %s3075_s10 }
  0x10   : > { %p55_p0 = scmp.eq.s32.totalorder %s3083_s12, 0  ;;  %p2923_p3 = scmp.lt.s32.totalorder %s3083_s12, 2 }
  0x11   : > { %p3163_p11 = pnand %p2910_p10, %p3707_p1  ;;  %s2970_s25 = scalar_lea.hbm %s3704_s0, 32 }
  0x12   : > { %p2971_p5 = scmp.ne.s32.totalorder %s3704_s0, %s2970_s25  ;;  %p2977_p1 = scmp.lt.u32.totalorder %s2970_s25, %s3704_s0 }
  0x13   : > { %p2972_p7 = pneg %p3163_p11 }
  0x15   : > { %p2973_p10 = pnand %p2972_p7, %p2971_p5 }
  0x17   : > { %p2974_p9 = pneg %p2973_p10 }
  0x19   : > { %p2979_p2 = pnand %p2977_p1, %p2974_p9 }
  0x1b   : > { %2982 = shalt.err (!%p2979_p2)
}
  0x1c   : > { %s3085_s30 = smov [#allocation2]   ;;  %p56_p1 = por %p55_p0, %p54_p13 }
  0x1d   : > { %2913 = dma.hbm_to_smem (!%p3163_p11), %s3704_s0, 32, %s3085_s30, [#allocation5]  }
  0x1e   : > { %s3194_s5 = scalar_select %p3167_p12, %s3079_s11, %s47_s20  }
  0x1f   : > { %p3715_p2 = scmp.eq.s32.totalorder %s3129_s13, 1  ;;  %s119_s7 = sand.u32 1, %s3079_s11  }
  0x20   : > { %s2318_s8 = sshll.u32 %s3083_s12, 7  ;;  %s2317_s14 = sshll.u32 %s119_s7, 3 }
  0x21   : > { %p3206_p9 = por %p3715_p2, %p54_p13  ;;  %s3215_s23 = scalar_lea.hbm %s3705_s1, %s2318_s8 }
  0x22   : > { %s123_s20 = scalar_lea.vmem [#allocation6], %s2317_s14  ;;  %p3219_p11 = pnand %p2923_p3, %p56_p1 }
  0x23   : > { %s3716_s6 = scalar_select %p3206_p9, 1, 0 }
  0x24   : > { %s130_s22 = sshll.u32 %s123_s20, 4  ;;  %s120_s25 = scalar_lea.sflag [#allocation3], %s119_s7  ;;  %s3223_s22 = int_to_ptr.vmem [resolvable:$true] %s130_s22 }
  0x25   : > { %s2983_s26 = scalar_lea.hbm %s3215_s23, 128  ;;  %p2985_p13 = pneg %p3219_p11 }
  0x26   : > { %p2984_p12 = scmp.ne.s32.totalorder %s3215_s23, %s2983_s26  ;;  %s2988_s29 = scalar_lea.hbm %s3705_s1, 256 }
  0x27   : > { %p2989_p3 = scmp.lt.u32.totalorder %s3215_s23, %s3705_s1  ;;  %p2990_p7 = scmp.lt.u32.totalorder %s2988_s29, %s2983_s26 }
  0x28   : > { %p2986_p0 = pnand %p2985_p13, %p2984_p12  ;;  %p2992_p1 = scmp.lt.u32.totalorder %s2983_s26, %s3215_s23 }
  0x29   : > { %p2991_p10 = por %p2990_p7, %p2989_p3 }
  0x2a   : > { %p2987_p5 = pneg %p2986_p0 }
  0x2b   : > { %p2993_p2 = por %p2992_p1, %p2991_p10 }
  0x2d   : > { %p2994_p6 = pnand %p2993_p2, %p2987_p5 }
  0x2f   : > { %2997 = shalt.err (!%p2994_p6)
}
  0x30   : > { %s2998_s4 = scalar_lea.vmem %s3223_s22, 128  ;;  %s3086_s7 = smov [#allocation6]  }
  0x31   : > { %p2999_p12 = scmp.ne.s32.totalorder %s3223_s22, %s2998_s4  ;;  %s3003_s8 = sshll.u32 %s3086_s7, 4  ;;  %s3004_s8 = int_to_ptr.vmem [resolvable:$false] %s3003_s8 }
  0x32   : > { %s3005_s14 = scalar_lea.vmem %s3004_s8, 256  ;;  %p3006_p4 = scmp.lt.s32.totalorder %s3223_s22, %s3004_s8 }
  0x33   : > { %p3001_p0 = pnand %p2999_p12, %p2985_p13  ;;  %p3007_p3 = scmp.lt.s32.totalorder %s3005_s14, %s2998_s4 }
  0x35   : > { %p3002_p9 = pneg %p3001_p0  ;;  %p3008_p7 = por %p3007_p3, %p3006_p4 }
  0x37   : > { %p3009_p10 = pnand %p3008_p7, %p3002_p9 }
  0x39   : > { %3012 = shalt.err (!%p3009_p10)
}
  0x3a   : > { %2917 = dma.hbm_to_vmem [thread:$0]  (!%p3219_p11), %s3215_s23, 128, %s3223_s22, %s120_s25  }
  0x3b   : > { %139 = sbr.rel (%p3148_p8) target bundleno = 810 (0x32a), region = 28  ;;  %p3718_p6 = scmp.eq.s32.totalorder (!%p3148_p8), %s3129_s13, 0 }
  0x42   : > { %3058 = dma.done.wait (%p3718_p6), [#allocation5], 32   ;;  %p3719_p13 = pmov %p3718_p6 }
  0x43   : > { %s3257_s19 = sand.u32 1, %s3075_s10   ;;  %p3720_p4 = scmp.ne.s32.totalorder %s3710_s15, 0 }
  0x44   : > { %3060 = vsyncadd (%p3719_p13), [#allocation5], 4294967264  ;;  %s2321_s21 = sshll.u32 %s3257_s19, 3  ;;  %s146_s20 = scalar_lea.sflag [#allocation3], %s3257_s19 }
  0x45   : > { %s149_s23 = scalar_lea.vmem [#allocation6], %s2321_s21 }
  0x46   : > { %3062 = dma.done.wait (%p3720_p4), %s146_s20, 128  }
  0x47   : > { %3064 = vsyncadd (%p3720_p4), %s146_s20, 4294967168 }
  0x48   : > { %154 = sfence }
  0x49   : > { %v172_v0 = vlaneseq  ;;  %v171_v1 = vld [vmem:[%s149_s23] sm:$0xff]  ;;  %v3087_v2 = vmov 0.0|0.0   ;;  %vm219_vm0 = vcmask 261120   ;;  %vm3088_vm1 = vmmov 0   ;;  %s1678_s15 = sld [smem:[#allocation2]]  ;;  %s2371_s22 = sld [smem:[#allocation2 + $0x1]] }
  0x4a   : > { %2737 = vmatprep.subr.bf16.mxu1 %v3087_v2  ;;  %2743 = vmatprep.subr.bf16.mxu0 %v3087_v2  ;;  %v3089_v5 = vmov 0.0   ;;  %v221_v6 = vsel %vm219_vm0, %v171_v1, 0  ;;  %v3090_v21 = vmov 1.0|1.0   ;;  %s2373_s17 = sld [smem:[#allocation2 + $0x80]]  ;;  %s2374_s24 = sld [smem:[#allocation2 + $0x81]] }
  0x4b   : > { %v3269_v3 = vshrl.u32 %v172_v0, 7  ;;  %v3271_v4 = vand.u32 127, %v172_v0  ;;  %2505 = vmatprep.mubr.msk.f32.mxu1 %vm3088_vm1, %v3089_v5  ;;  %2516 = vmatprep.mubr.msk.f32.mxu0 %vm3088_vm1, %v3089_v5  ;;  %v3277_v7 = vand.u32 4294901760, %v221_v6  ;;  %s2372_s25 = sld [smem:[#allocation2 + $0x2]]  ;;  %s3091_s27 = smov 8  }
  0x4c   : > { %s2375_s26 = sld [smem:[#allocation2 + $0x82]]  ;;  %s170_s28 = scalar_lea.vmem [#allocation7], %s2321_s21 }
  0x4d   : > { %v3280_v8 = vadd.s32 8, %v3269_v3  ;;  %v3283_v9 = vmul.u32 4, %v3271_v4  ;;  %v3286_v10 = vadd.s32 16, %v3269_v3  ;;  %v3289_v11 = vadd.s32 24, %v3269_v3  ;;  %s2231_s29 = sshll.u32 %s170_s28, 4  ;;  %s2386_s30 = sshll.u32 %s3129_s13, 7  ;;  %s3657_s29 = int_to_ptr.vmem [resolvable:$true] %s2231_s29 }
  0x4e   : > { %v3292_v12 = vsub.f32 %v221_v6, %v3277_v7  ;;  %s3662_s7 = scalar_lea.hbm %s3706_s2, %s2386_s30  ;;  %s2218_s8 = scalar_lea.sflag [#allocation4], %s3257_s19 }
  0x4f   : > { %v180_v13 = vadd.s32 1, %v3283_v9  ;;  %v193_v15 = vadd.s32 2, %v3283_v9  ;;  %s3013_s14 = scalar_lea.vmem %s3657_s29, 128  ;;  %p3735_p9 = scmp.ne.s32.totalorder %s3716_s6, 0 }
  0x50   : > { %v3296_v14 = vand.u32 4294901760, %v3292_v12  ;;  %p3014_p8 = scmp.ne.s32.totalorder %s3657_s29, %s3013_s14  ;;  %s3092_s13 = smov [#allocation7]  }
  0x51   : > { %vm181_vm2 = vcmp.eq.s32.totalorder %v3269_v3, %v180_v13  ;;  %vm182_vm3 = vcmp.eq.s32.totalorder %v3280_v8, %v180_v13  ;;  %vm183_vm4 = vcmp.eq.s32.totalorder %v3286_v10, %v180_v13  ;;  %vm184_vm5 = vcmp.eq.s32.totalorder %v3289_v11, %v180_v13  ;;  %s3017_s21 = sshll.u32 %s3092_s13, 4  ;;  %s3018_s21 = int_to_ptr.vmem [resolvable:$false] %s3017_s21 }
  0x52   : > { %v2323_v16 = vsel %vm181_vm2, 1.0, %v3089_v5  ;;  %v2324_v17 = vsel %vm182_vm3, 1.0, %v3089_v5  ;;  %vm3305_vm6 = vmpackc.low %vm182_vm3, %vm181_vm2  ;;  %v2325_v19 = vsel %vm183_vm4, 1.0, %v3089_v5  ;;  %v2326_v20 = vsel %vm184_vm5, 1.0, %v3089_v5  ;;  %p3015_p11 = pnand %p3014_p8, %p3735_p9  ;;  %s3019_s20 = scalar_lea.vmem %s3018_s21, 256 }
  0x53   : > { %2739 = vmatpush3.bf16.msk.msra.mxu1 %vm3305_vm6, %v3090_v21  ;;  %v3314_v22 = vsub.f32 %v2323_v16, %v2323_v16  ;;  %v3316_v23 = vsub.f32 %v2324_v17, %v2324_v17  ;;  %v3318_v24 = vsub.f32 %v2325_v19, %v2325_v19  ;;  %v3320_v25 = vsub.f32 %v2326_v20, %v2326_v20  ;;  %vm3323_vm7 = vmpackc.low %vm184_vm5, %vm183_vm4  ;;  %p3020_p1 = scmp.lt.s32.totalorder %s3657_s29, %s3018_s21  ;;  %p3021_p2 = scmp.lt.s32.totalorder %s3019_s20, %s3013_s14 }
  0x54   : > { %2740 = vmatprep.subr.bf16.mxu1 %v3087_v2  ;;  %v295_v27 = vsub.f32 %v3292_v12, %v3296_v14  ;;  %vm194_vm8 = vcmp.eq.s32.totalorder %v3269_v3, %v193_v15  ;;  %vm195_vm9 = vcmp.eq.s32.totalorder %v3280_v8, %v193_v15  ;;  %vm196_vm10 = vcmp.eq.s32.totalorder %v3286_v10, %v193_v15  ;;  %p3016_p5 = pneg %p3015_p11 }
  0x55   : > { %v2327_v28 = vsel %vm194_vm8, 1.0, %v3089_v5  ;;  %v2328_v29 = vsel %vm195_vm9, 1.0, %v3089_v5  ;;  %v305_v30 = vand.u32 4294901760, %v3314_v22  ;;  %v312_v31 = vand.u32 4294901760, %v3316_v23  ;;  %vm3367_vm12 = vmpackc.low %vm195_vm9, %vm194_vm8  ;;  %p3022_p12 = por %p3021_p2, %p3020_p1 }
  0x56   : > { %v3340_v32 = vand.u32 4294901760, %v295_v27  ;;  %v3342_v33 = vsub.f32 %v2327_v28, %v2327_v28  ;;  %v3344_v34 = vsub.f32 %v2328_v29, %v2328_v29  ;;  %vm197_vm11 = vcmp.eq.s32.totalorder %v3289_v11, %v193_v15 }
  0x57   : > { %2742 = vmatpush3.bf16.msk.msra.mxu1 %vm3323_vm7, %v3090_v21  ;;  %v306_v35 = vsub.f32 %v3314_v22, %v305_v30  ;;  %v313_v36 = vsub.f32 %v3316_v23, %v312_v31  ;;  %v2329_v37 = vsel %vm196_vm10, 1.0, %v3089_v5  ;;  %v2330_v38 = vsel %vm197_vm11, 1.0, %v3089_v5  ;;  %vm3404_vm13 = vmpackc.low %vm197_vm11, %vm196_vm10  ;;  %p3023_p0 = pnand %p3022_p12, %p3016_p5 }
  0x58   : > { %2773 = vmatprep.subr.bf16.mxu1 %v3087_v2  ;;  %v3371_v40 = vsub.f32 %v2329_v37, %v2329_v37  ;;  %v3373_v41 = vsub.f32 %v2330_v38, %v2330_v38  ;;  %v319_v42 = vand.u32 4294901760, %v3318_v24  ;;  %v326_v43 = vand.u32 4294901760, %v3320_v25 }
  0x59   : > { %v307_v44 = vand.u32 4294901760, %v306_v35  ;;  %v314_v45 = vand.u32 4294901760, %v313_v36  ;;  %v790_v46 = vand.u32 4294901760, %v3342_v33  ;;  %v797_v47 = vand.u32 4294901760, %v3344_v34 }
  0x5a   : > { %2506 = vmatmul.mubr.f32.vlgmr.msra.gmra.mrb[0].mxu1 %v3340_v32  ;;  %v320_v48 = vsub.f32 %v3318_v24, %v319_v42  ;;  %v327_v49 = vsub.f32 %v3320_v25, %v326_v43  ;;  %v804_v50 = vand.u32 4294901760, %v3371_v40  ;;  %v811_v54 = vand.u32 4294901760, %v3373_v41 }
  0x5b   : > { %2775 = vmatpush3.bf16.msk.msra.mxu1 %vm3367_vm12, %v3090_v21  ;;  %v2744_v51 = vpack.c.bf16 %v314_v45, %v307_v44  ;;  %2571 = vmatprep.mubr.msk.f32.mxu1 %vm3088_vm1, %v3089_v5  ;;  %v791_v52 = vsub.f32 %v3342_v33, %v790_v46  ;;  %v798_v53 = vsub.f32 %v3344_v34, %v797_v47  ;;  %v3450_v19 = vadd.s32 3, %v3283_v9 }
  0x5c   : > { %2776 = vmatprep.subr.bf16.mxu1 %v3087_v2  ;;  %v321_v56 = vand.u32 4294901760, %v320_v48  ;;  %v328_v57 = vand.u32 4294901760, %v327_v49  ;;  %v805_v58 = vsub.f32 %v3371_v40, %v804_v50  ;;  %v812_v61 = vsub.f32 %v3373_v41, %v811_v54 }
  0x5d   : > { %2745 = vmatpush3.bf16.msra.mxu0 %v2744_v51  ;;  %v792_v59 = vand.u32 4294901760, %v791_v52  ;;  %v799_v60 = vand.u32 4294901760, %v798_v53  ;;  %v2750_v6 = vpack.c.bf16 %v3316_v23, %v3314_v22  ;;  %v2753_v15 = vpack.c.bf16 %v3320_v25, %v3318_v24 }
  0x5e   : > { %2746 = vmatprep.subr.bf16.mxu0 %v3087_v2  ;;  %v2747_v62 = vpack.c.bf16 %v328_v57, %v321_v56  ;;  %v806_v0 = vand.u32 4294901760, %v805_v58  ;;  %v813_v1 = vand.u32 4294901760, %v812_v61  ;;  %v2786_v16 = vpack.c.bf16 %v3344_v34, %v3342_v33 }
  0x5f   : > { %2778 = vmatpush3.bf16.msk.msra.mxu1 %vm3404_vm13, %v3090_v21  ;;  %v2780_v63 = vpack.c.bf16 %v799_v60, %v792_v59  ;;  %v2789_v17 = vpack.c.bf16 %v3373_v41, %v3371_v40  ;;  %v2762_v20 = vpack.c.bf16 %v312_v31, %v305_v30  ;;  %vm207_vm14 = vcmp.eq.s32.totalorder %v3269_v3, %v3450_v19 }
  0x60   : > { %2779 = vmatprep.subr.bf16.mxu1 %v3087_v2  ;;  %v2783_v13 = vpack.c.bf16 %v813_v1, %v806_v0  ;;  %vm208_vm15 = vcmp.eq.s32.totalorder %v3280_v8, %v3450_v19  ;;  %v2765_v9 = vpack.c.bf16 %v326_v43, %v319_v42  ;;  %v2331_v22 = vsel %vm207_vm14, 1.0, %v3089_v5 }
  0x61   : > { %2748 = vmatpush3.bf16.msra.mxu0 %v2747_v62  ;;  %v2332_v23 = vsel %vm208_vm15, 1.0, %v3089_v5  ;;  %v2798_v24 = vpack.c.bf16 %v797_v47, %v790_v46  ;;  %vm209_vm0 = vcmp.eq.s32.totalorder %v3286_v10, %v3450_v19  ;;  %vm210_vm2 = vcmp.eq.s32.totalorder %v3289_v11, %v3450_v19  ;;  %vm3544_vm3 = vmpackc.low %vm208_vm15, %vm207_vm14 }
  0x62   : > { %2572 = vmatmul.mubr.f32.vlgmr.msra.gmra.mrb[2].mxu1 %v3340_v32  ;;  %2749 = vmatprep.subr.bf16.mxu0 %v3087_v2  ;;  %v3500_v25 = vsub.f32 %v2331_v22, %v2331_v22  ;;  %v3502_v27 = vsub.f32 %v2332_v23, %v2332_v23  ;;  %v2333_v28 = vsel %vm209_vm0, 1.0, %v3089_v5  ;;  %v2334_v29 = vsel %vm210_vm2, 1.0, %v3089_v5  ;;  %vm3567_vm4 = vmpackc.low %vm210_vm2, %vm209_vm0 }
  0x63   : > { %2781 = vmatpush3.bf16.msra.mxu1 %v2780_v63  ;;  %2582 = vmatprep.mubr.msk.f32.mxu1 %vm3088_vm1, %v3089_v5  ;;  %v2801_v30 = vpack.c.bf16 %v811_v54, %v804_v50  ;;  %v1288_v31 = vsub.f32 %v2333_v28, %v2333_v28  ;;  %v1295_v33 = vsub.f32 %v2334_v29, %v2334_v29  ;;  %v1679_v51 = vstv %s1678_s15 }
  0x64   : > { %2517 = vmatmul.mubr.f32.vlgmr.msra.gmra.mrb[0].mxu0 %v3277_v7  ;;  %2782 = vmatprep.subr.bf16.mxu1 %v3087_v2  ;;  %v1275_v34 = vand.u32 4294901760, %v3500_v25  ;;  %v1282_v35 = vand.u32 4294901760, %v3502_v27  ;;  %v2822_v45 = vpack.c.bf16 %v3502_v27, %v3500_v25  ;;  %v1696_v52 = vstv %s2373_s17 }
  0x65   : > { %2751 = vmatpush3.bf16.msra.mxu0 %v2750_v6  ;;  %2527 = vmatprep.mubr.msk.f32.mxu0 %vm3088_vm1, %v3089_v5  ;;  %v1289_v37 = vand.u32 4294901760, %v1288_v31  ;;  %v1296_v38 = vand.u32 4294901760, %v1295_v33  ;;  %v2825_v46 = vpack.c.bf16 %v1295_v33, %v1288_v31  ;;  %v1682_v53 = vstv %s2371_s22 }
  0x66   : > { %2752 = vmatprep.subr.bf16.mxu0 %v3087_v2  ;;  %v1276_v18 = vsub.f32 %v3500_v25, %v1275_v34  ;;  %v1283_v36 = vsub.f32 %v3502_v27, %v1282_v35  ;;  %v1699_v54 = vstv %s2374_s24  ;;  %v1685_v6 = vstv %s2372_s25 }
  0x67   : > { %2784 = vmatpush3.bf16.msra.mxu1 %v2783_v13  ;;  %v1290_v41 = vsub.f32 %v1288_v31, %v1289_v37  ;;  %v1297_v42 = vsub.f32 %v1295_v33, %v1296_v38  ;;  %v1702_v13 = vstv %s2375_s26 }
  0x68   : > { %2785 = vmatprep.subr.bf16.mxu1 %v3087_v2  ;;  %v1277_v8 = vand.u32 4294901760, %v1276_v18  ;;  %v1284_v26 = vand.u32 4294901760, %v1283_v36 }
  0x69   : > { %2754 = vmatpush3.bf16.msra.mxu0 %v2753_v15  ;;  %v1291_v44 = vand.u32 4294901760, %v1290_v41  ;;  %v1298_v10 = vand.u32 4294901760, %v1297_v42 }
  0x6a   : > { %2583 = vmatmul.mubr.f32.vlgmr.msra.gmra.mrb[2].mxu1 %v3277_v7  ;;  %2755 = vmatprep.subr.bf16.mxu0 %v3087_v2  ;;  %v2816_v43 = vpack.c.bf16 %v1284_v26, %v1277_v8 }
  0x6b   : > { %2787 = vmatpush3.bf16.msra.mxu1 %v2786_v16  ;;  %2593 = vmatprep.mubr.msk.f32.mxu1 %vm3088_vm1, %v3089_v5  ;;  %v2819_v11 = vpack.c.bf16 %v1298_v10, %v1291_v44 }
  0x6c   : > { %2528 = vmatmul.mubr.f32.vlgmr.msra.gmra.mrb[0].mxu0 %v3292_v12  ;;  %2788 = vmatprep.subr.bf16.mxu1 %v3087_v2 }
  0x6d   : > { %2757 = vmatpush3.bf16.msk.msra.mxu0 %vm3305_vm6, %v3090_v21  ;;  %2538 = vmatprep.mubr.msk.f32.mxu0 %vm3088_vm1, %v3089_v5 }
  0x6e   : > { %2758 = vmatprep.subr.bf16.mxu0 %v3087_v2 }
  0x6f   : > { %2790 = vmatpush3.bf16.msra.mxu1 %v2789_v17 }
  0x70   : > { %2791 = vmatprep.subr.bf16.mxu1 %v3087_v2 }
  0x71   : > { %2760 = vmatpush3.bf16.msk.msra.mxu0 %vm3323_vm7, %v3090_v21 }
  0x72   : > { %2594 = vmatmul.mubr.f32.vlgmr.msra.gmra.mrb[2].mxu1 %v3292_v12  ;;  %2761 = vmatprep.subr.bf16.mxu0 %v3087_v2 }
  0x73   : > { %2793 = vmatpush3.bf16.msk.msra.mxu1 %vm3367_vm12, %v3090_v21  ;;  %2604 = vmatprep.mubr.msk.f32.mxu1 %vm3088_vm1, %v3089_v5 }
  0x74   : > { %2539 = vmatmul.mubr.f32.vlgmr.msra.gmra.mrb[0].mxu0 %v3296_v14  ;;  %2794 = vmatprep.subr.bf16.mxu1 %v3087_v2 }
  0x75   : > { %2763 = vmatpush3.bf16.msra.mxu0 %v2762_v20  ;;  %2549 = vmatprep.mubr.msk.f32.mxu0 %vm3088_vm1, %v3089_v5 }
  0x76   : > { %2764 = vmatprep.subr.bf16.mxu0 %v3087_v2 }
  0x77   : > { %2796 = vmatpush3.bf16.msk.msra.mxu1 %vm3404_vm13, %v3090_v21 }
  0x78   : > { %2797 = vmatprep.subr.bf16.mxu1 %v3087_v2 }
  0x79   : > { %2766 = vmatpush3.bf16.msra.mxu0 %v2765_v9 }
  0x7a   : > { %2605 = vmatmul.mubr.f32.vlgmr.msra.gmra.mrb[2].mxu1 %v3296_v14  ;;  %2767 = vmatprep.subr.bf16.mxu0 %v3087_v2 }
  0x7b   : > { %2799 = vmatpush3.bf16.msra.mxu1 %v2798_v24  ;;  %2615 = vmatprep.mubr.msk.f32.mxu1 %vm3088_vm1, %v3089_v5  ;;  %v1723_v24 = vmul.u32 16, %v3269_v3 }
  0x7c   : > { %2550 = vmatmul.mubr.f32.vlgmr.msra.gmra.mrb[0].mxu0 %v3277_v7  ;;  %2800 = vmatprep.subr.bf16.mxu1 %v3087_v2 }
  0x7d   : > { %2769 = vmatpush3.bf16.msk.msra.mxu0 %vm3305_vm6, %v3090_v21  ;;  %2560 = vmatprep.mubr.msk.f32.mxu0 %vm3088_vm1, %v3089_v5  ;;  %v1732_v25 = vsub.s32 %v3271_v4, %v1723_v24  ;;  %vm1725_vm9 = vcmp.eq.s32.totalorder %v3271_v4, %v1723_v24 }
  0x7e   : > { %2770 = vmatprep.subr.bf16.mxu0 %v3087_v2  ;;  %v2377_v33 = vsel %vm1725_vm9, 1.0, %v3089_v5 }
  0x7f   : > { %2802 = vmatpush3.bf16.msra.mxu1 %v2801_v30  ;;  %vm1736_vm5 = vcmp.eq.s32.totalorder %v1732_v25, 5  ;;  %vm1738_vm6 = vcmp.eq.s32.totalorder %v1732_v25, 10  ;;  %vm1742_vm8 = vcmp.eq.s32.totalorder %v1732_v25, 15 }
  0x80   : > { %2803 = vmatprep.subr.bf16.mxu1 %v3087_v2 }
  0x81   : > { %2772 = vmatpush3.bf16.msk.msra.mxu0 %vm3323_vm7, %v3090_v21  ;;  %vm1740_vm7 = vmor %vm1736_vm5, %vm1738_vm6 }
  0x82   : > { %2616 = vmatmul.mubr.f32.vlgmr.msra.gmra.mrb[2].mxu1 %v3277_v7  ;;  %2809 = vmatprep.subr.bf16.mxu0 %v3087_v2  ;;  %vm1744_vm10 = vmor %vm1740_vm7, %vm1742_vm8 }
  0x83   : > { %2805 = vmatpush3.bf16.msk.msra.mxu1 %vm3367_vm12, %v3090_v21  ;;  %2626 = vmatprep.mubr.msk.f32.mxu1 %vm3088_vm1, %v3089_v5  ;;  %vm3626_vm11 = vmpackc.low %vm1744_vm10, %vm1725_vm9  ;;  %vm1719_vm12 = vcmask 64512  }
  0x84   : > { %2561 = vmatmul.mubr.f32.vlgmr.msra.gmra.mrb[0].mxu0 %v3277_v7  ;;  %2806 = vmatprep.subr.bf16.mxu1 %v3087_v2 }
  0x85   : > { %2811 = vmatpush3.bf16.msk.msra.mxu0 %vm3544_vm3, %v3090_v21  ;;  %2637 = vmatprep.mubr.msk.f32.mxu0 %vm3088_vm1, %v3089_v5 }
  0x86   : > { %2812 = vmatprep.subr.bf16.mxu0 %v3087_v2 }
  0x87   : > { %2808 = vmatpush3.bf16.msk.msra.mxu1 %vm3404_vm13, %v3090_v21  ;;  %vm1753_vm13 = vcmask 130048  }
  0x88   : > { %2845 = vmatprep.subr.bf16.mxu1 %v3087_v2 }
  0x89   : > { %2814 = vmatpush3.bf16.msk.msra.mxu0 %vm3567_vm4, %v3090_v21 }
  0x8a   : > { %2627 = vmatmul.mubr.f32.vlgmr.msra.gmra.mrb[2].mxu1 %v3277_v7  ;;  %2815 = vmatprep.subr.bf16.mxu0 %v3087_v2 }
  0x8b   : > { %2699 = vmatprep.mubr.msk.f32.mxu1 %vm3088_vm1, %v3089_v5  ;;  %2847 = vmatpush3.bf16.msk.msra.mxu1 %vm3626_vm11, %v3090_v21 }
  0x8c   : > { %2638 = vmatmul.mubr.f32.vlgmr.msra.gmra.mrb[2].mxu0 %v3340_v32  ;;  %v2834_v32 = vpack.c.bf16 %v1282_v35, %v1275_v34  ;;  %v2378_v34 = vsel %vm1744_vm10, 1.0, %v3089_v5  ;;  %v1836_v35 = vsub.f32 %v2377_v33, %v2377_v33  ;;  %2848 = vmatprep.subr.bf16.mxu1 %v3087_v2 }
  0x8d   : > { %2817 = vmatpush3.bf16.msra.mxu0 %v2816_v43  ;;  %2648 = vmatprep.mubr.msk.f32.mxu0 %vm3088_vm1, %v3089_v5  ;;  %v1843_v18 = vsub.f32 %v2378_v34, %v2378_v34 }
  0x8e   : > { %2818 = vmatprep.subr.bf16.mxu0 %v3087_v2  ;;  %v1837_v4 = vand.u32 4294901760, %v1836_v35 }
  0x8f   : > { %v2852_v39 = vpack.c.bf16 %v1843_v18, %v1836_v35 }
  0x90   : > { %v1838_v40 = vsub.f32 %v1836_v35, %v1837_v4 }
  0x91   : > { %2820 = vmatpush3.bf16.msra.mxu0 %v2819_v11 }
  0x92   : > { %2821 = vmatprep.subr.bf16.mxu0 %v3087_v2  ;;  %v1839_v26 = vand.u32 4294901760, %v1838_v40 }
  0x94   : > { %2649 = vmatmul.mubr.f32.vlgmr.msra.gmra.mrb[2].mxu0 %v3277_v7 }
  0x95   : > { %2823 = vmatpush3.bf16.msra.mxu0 %v2822_v45  ;;  %2659 = vmatprep.mubr.msk.f32.mxu0 %vm3088_vm1, %v3089_v5 }
  0x96   : > { %2824 = vmatprep.subr.bf16.mxu0 %v3087_v2 }
  0x99   : > { %2826 = vmatpush3.bf16.msra.mxu0 %v2825_v46 }
  0x9a   : > { %2827 = vmatprep.subr.bf16.mxu0 %v3087_v2 }
  0x9c   : > { %2660 = vmatmul.mubr.f32.vlgmr.msra.gmra.mrb[2].mxu0 %v3292_v12  ;;  %v2837_v12 = vpack.c.bf16 %v1296_v38, %v1289_v37  ;;  %v1844_v37 = vand.u32 4294901760, %v1843_v18 }
  0x9d   : > { %2829 = vmatpush3.bf16.msk.msra.mxu0 %vm3544_vm3, %v3090_v21  ;;  %2670 = vmatprep.mubr.msk.f32.mxu0 %vm3088_vm1, %v3089_v5 }
  0x9e   : > { %2830 = vmatprep.subr.bf16.mxu0 %v3087_v2  ;;  %v1845_v8 = vsub.f32 %v1843_v18, %v1844_v37  ;;  %v2858_v43 = vpack.c.bf16 %v1844_v37, %v1837_v4 }
  0xa0   : > { %v1846_v41 = vand.u32 4294901760, %v1845_v8 }
  0xa1   : > { %2832 = vmatpush3.bf16.msk.msra.mxu0 %vm3567_vm4, %v3090_v21 }
  0xa2   : > { %2833 = vmatprep.subr.bf16.mxu0 %v3087_v2  ;;  %v2849_v42 = vpack.c.bf16 %v1846_v41, %v1839_v26 }
  0xa4   : > { %2671 = vmatmul.mubr.f32.vlgmr.msra.gmra.mrb[2].mxu0 %v3296_v14 }
  0xa5   : > { %2835 = vmatpush3.bf16.msra.mxu0 %v2834_v32  ;;  %2681 = vmatprep.mubr.msk.f32.mxu0 %vm3088_vm1, %v3089_v5 }
  0xa6   : > { %2836 = vmatprep.subr.bf16.mxu0 %v3087_v2 }
  0xa9   : > { %2838 = vmatpush3.bf16.msra.mxu0 %v2837_v12 }
  0xaa   : > { %2839 = vmatprep.subr.bf16.mxu0 %v3087_v2 }
  0xac   : > { %2682 = vmatmul.mubr.f32.vlgmr.msra.gmra.mrb[2].mxu0 %v3277_v7 }
  0xad   : > { %2841 = vmatpush3.bf16.msk.msra.mxu0 %vm3544_vm3, %v3090_v21  ;;  %2692 = vmatprep.mubr.msk.f32.mxu0 %vm3088_vm1, %v3089_v5 }
  0xae   : > { %2842 = vmatprep.subr.bf16.mxu0 %v3087_v2 }
  0xb1   : > { %2844 = vmatpush3.bf16.msk.msra.mxu0 %vm3567_vm4, %v3090_v21 }
  0xb4   : > { %2693 = vmatmul.mubr.f32.vlgmr.msra.gmra.mrb[2].mxu0 %v3277_v7 }
 0x12d   : > { %v298_v14 = vpop.f32.mrb[0].mxu1 }
 0x12e   : > { %v2507_v47 = vpop.f32.mrb[1].mxu1 }
 0x157   : > { %v704_v48 = vpop.f32.mrb[0].mxu0 }
 0x158   : > { %v2863_v49 = vadd.f32 %v704_v48, %v298_v14  ;;  %v2562_v50 = vpop.f32.mrb[1].mxu0 }
 0x15a   : > { %v1680_v55 = vsub.f32 %v2863_v49, %v1679_v51  ;;  %v1697_v56 = vsub.f32 %v2863_v49, %v1696_v52 }
 0x15c   : > { %v1687_v7 = vmul.f32 %v1680_v55, %v1680_v55  ;;  %v1704_v61 = vmul.f32 %v1697_v56, %v1697_v56 }
 0x15d   : > { %v1189_v57 = vpop.f32.mrb[2].mxu1 }
 0x15e   : > { %v1683_v58 = vsub.f32 %v1189_v57, %v1682_v53  ;;  %v1700_v59 = vsub.f32 %v1189_v57, %v1699_v54  ;;  %v2628_v60 = vpop.f32.mrb[3].mxu1 }
 0x160   : > { %v1688_v62 = vmul.f32 %v1683_v58, %v1683_v58  ;;  %v1705_v63 = vmul.f32 %v1700_v59, %v1700_v59 }
 0x162   : > { %v1689_v0 = vadd.f32 %v1688_v62, %v1687_v7  ;;  %v1706_v1 = vadd.f32 %v1705_v63, %v1704_v61 }
 0x187   : > { %v1674_v15 = vpop.f32.mrb[2].mxu0 }
 0x188   : > { %v1686_v16 = vsub.f32 %v1674_v15, %v1685_v6  ;;  %v1703_v17 = vsub.f32 %v1674_v15, %v1702_v13  ;;  %v2694_v19 = vpop.f32.mrb[3].mxu0 }
 0x18a   : > { %v1690_v20 = vmul.f32 %v1686_v16, %v1686_v16  ;;  %v1707_v9 = vmul.f32 %v1703_v17, %v1703_v17 }
 0x18c   : > { %v1691_v22 = vadd.f32 %v1690_v20, %v1689_v0  ;;  %v1708_v23 = vadd.f32 %v1707_v9, %v1706_v1 }
 0x18e   : > { %2964 = vrsqrt.f32 %v1691_v22 }
 0x18f   : > { %2966 = vrsqrt.f32 %v1708_v23 }
 0x198   : > { %v2965_v27 = vpop.eup %2964 }
 0x199   : > { %v2967_v28 = vpop.eup %2966  ;;  %v1693_v29 = vmul.f32 0.5, %v2965_v27 }
 0x19a   : > { %v1710_v31 = vmul.f32 0.5, %v2967_v28 }
 0x19b   : > { %v1694_v30 = vadd.f32 1.0, %v1693_v29 }
 0x19d   : > { %v1711_v36 = vadd.f32 %v1710_v31, %v1694_v30 }
 0x19f   : > { %v1712_v38 = vmul.f32 %v1711_v36, %v1711_v36 }
 0x1a1   : > { %1716 = vrot.lane.b32.xlu0 %v1712_v38, %s3091_s27  ;;  %2968 = vrcp.f32 %v1712_v38 }
 0x1ab   : > { %v2969_v44 = vpop.eup %2968 }
 0x213   : > { %v1717_v10 = vpop.permute.xlu0 %1716 }
 0x214   : > { %v1720_v11 = vsel %vm1719_vm12, %v2969_v44, %v1717_v10 }
 0x215   : > { %v1755_v45 = vsel %vm1753_vm13, %v1720_v11, 0 }
 0x216   : > { %v1824_v46 = vand.u32 4294901760, %v1755_v45 }
 0x218   : > { %v1825_v32 = vsub.f32 %v1755_v45, %v1824_v46 }
 0x21a   : > { %v1826_v12 = vand.u32 4294901760, %v1825_v32 }
 0x21c   : > { %v1827_v14 = vsub.f32 %v1825_v32, %v1826_v12 }
 0x21e   : > { %v1828_v47 = vand.u32 4294901760, %v1827_v14 }
 0x220   : > { %2700 = vmatmul.mubr.f32.vlgmr.msra.gmra.mrb[4].mxu1 %v1828_v47 }
 0x221   : > { %2850 = vmatpush3.bf16.msra.mxu1 %v2849_v42  ;;  %2706 = vmatprep.mubr.msk.f32.mxu1 %vm3088_vm1, %v3089_v5 }
 0x222   : > { %2851 = vmatprep.subr.bf16.mxu1 %v3087_v2 }
 0x228   : > { %2707 = vmatmul.mubr.f32.vlgmr.msra.gmra.mrb[4].mxu1 %v1824_v46 }
 0x229   : > { %2853 = vmatpush3.bf16.msra.mxu1 %v2852_v39  ;;  %2713 = vmatprep.mubr.msk.f32.mxu1 %vm3088_vm1, %v3089_v5 }
 0x22a   : > { %2854 = vmatprep.subr.bf16.mxu1 %v3087_v2 }
 0x230   : > { %2714 = vmatmul.mubr.f32.vlgmr.msra.gmra.mrb[4].mxu1 %v1825_v32 }
 0x231   : > { %2856 = vmatpush3.bf16.msk.msra.mxu1 %vm3626_vm11, %v3090_v21  ;;  %2720 = vmatprep.mubr.msk.f32.mxu1 %vm3088_vm1, %v3089_v5 }
 0x232   : > { %2857 = vmatprep.subr.bf16.mxu1 %v3087_v2 }
 0x238   : > { %2721 = vmatmul.mubr.f32.vlgmr.msra.gmra.mrb[4].mxu1 %v1826_v12 }
 0x239   : > { %2859 = vmatpush3.bf16.msra.mxu1 %v2858_v43  ;;  %2727 = vmatprep.mubr.msk.f32.mxu1 %vm3088_vm1, %v3089_v5 }
 0x23a   : > { %2860 = vmatprep.subr.bf16.mxu1 %v3087_v2 }
 0x240   : > { %2728 = vmatmul.mubr.f32.vlgmr.msra.gmra.mrb[4].mxu1 %v1824_v46 }
 0x241   : > { %2862 = vmatpush3.bf16.msk.msra.mxu1 %vm3626_vm11, %v3090_v21  ;;  %2734 = vmatprep.mubr.msk.f32.mxu1 %vm3088_vm1, %v3089_v5 }
 0x248   : > { %2735 = vmatmul.mubr.f32.vlgmr.msra.gmra.mrb[4].mxu1 %v1824_v46 }
 0x31b   : > { %v2212_v2 = vpop.f32.mrb[4].mxu1 }
 0x31c   : > { %2216 = vst [vmem:[%s170_s28] sm:$0xff] %v2212_v2  ;;  %v2736_v21 = vpop.f32.mrb[5].mxu1 }
 0x31d   : > { %3026 = shalt.err (!%p3023_p0)
}
 0x31e   : > { %s3027_s19 = scalar_lea.hbm %s3662_s7, 128  ;;  %s3031_s17 = scalar_lea.hbm %s3706_s2, 256 }
 0x31f   : > { %p3028_p3 = scmp.ne.s32.totalorder %s3662_s7, %s3027_s19  ;;  %p3032_p6 = scmp.lt.u32.totalorder %s3662_s7, %s3706_s2 }
 0x320   : > { %p3033_p13 = scmp.lt.u32.totalorder %s3031_s17, %s3027_s19  ;;  %p3035_p8 = scmp.lt.u32.totalorder %s3027_s19, %s3662_s7 }
 0x321   : > { %p3029_p7 = pnand %p3028_p3, %p3735_p9 }
 0x322   : > { %p3034_p4 = por %p3033_p13, %p3032_p6 }
 0x323   : > { %p3030_p10 = pneg %p3029_p7 }
 0x324   : > { %p3036_p11 = por %p3035_p8, %p3034_p4 }
 0x326   : > { %p3037_p5 = pnand %p3036_p11, %p3030_p10 }
 0x328   : > { %3040 = shalt.err (!%p3037_p5)
}
 0x329   : > { %2908 = dma.vmem_to_hbm [thread:$0]  (%p3735_p9), %s3657_s29, 128, %s3662_s7, %s2218_s8  }
 0x32a PF: > { %s2243_s25 = sand.u32 1, %s3071_s9   ;;  %p3736_p1 = scmp.ne.s32.totalorder %s3711_s16, 0 }
 0x32b   : > { %p3737_p2 = scmp.ge.s32.totalorder %s3083_s12, 2  ;;  %s2244_s26 = scalar_lea.sflag [#allocation4], %s2243_s25 }
 0x32d   : > { %p2919_p12 = pnand %p3737_p2, %p3736_p1 }
 0x32f   : > { %3066 = dma.done.wait (!%p2919_p12), %s2244_s26, 128  }
 0x330   : > { %3068 = vsyncadd (!%p2919_p12), %s2244_s26, 4294967168  ;;  %p16_p0 = scmp.ge.s32.totalorder %s3154_s18, 4   ;;  %s3738_s9 = smov %s3075_s10 }
 0x331   : > { %s3739_s10 = smov %s3079_s11  ;;  %s3740_s11 = smov %s3194_s5 }
 0x332   : > { %s3741_s12 = smov %s3154_s18  ;;  %18 = sbr.rel (!%p16_p0) target bundleno = 6 (0x6), region = 78 }
 0x339   :  { %2249 = vsyncpa [#allocation3], 1 }
 0x33a   :  { %2251 = vsyncpa [#allocation3 + $0x1], 1 }
 0x33b   :  { %2252 = vsyncpa [#allocation4], 1 }
 0x33c   :  { %2254 = vsyncpa [#allocation4 + $0x1], 1 }
 0x33d   :  { %2255 = vsyncpa [#allocation5], 1 }
 0x33e   :  { %2257 = vsyncpa [#allocation5 + $0x1], 1 }

</bundles_post_ra>
